<compile_context>
chip_gen: v6e
topology: v6e:2x2x1
jax: 0.10.0
libtpu: 0.0.40
codegen_flags: <defaults>
</compile_context>

<pallas_src>
import functools

import jax
import jax.numpy as jnp
import numpy as np
from jax.experimental import pallas as pl
from jax.experimental.pallas import tpu as pltpu


# --------------------------------------------------------------------------
# Tile / VMEM sizing helpers (all trace-time Python on static shapes).
# --------------------------------------------------------------------------
def _round_up(x: int, m: int) -> int:
    return ((x + m - 1) // m) * m


def _vmem_budgets():
    """Generation-aware VMEM sizing (v5e/v6e: 128 MiB, v7x: 64 MiB)."""
    try:
        cap = int(pltpu.get_tpu_info().vmem_capacity_bytes)
    except Exception:  # info unavailable -> be conservative (v7x-sized)
        cap = 64 * 1024 * 1024
    stream_budget = int(cap * 0.60)   # budget for the double-buffered input tiles
    vmem_limit = int(cap * 0.75)      # scoped VMEM limit handed to Mosaic
    return stream_budget, vmem_limit


def _pick_tile_b(b: int) -> int:
    """Largest row block (multiple of 8) that divides b and leaves >= 2 blocks."""
    for cand in (1024, 512, 256, 128, 64, 32, 16, 8):
        if b % cand == 0 and b // cand >= 2:
            return cand
    return b   # small (or non-multiple-of-8) batch: single row block


def _pick_tile_d(d_pad: int, tb: int, itemsize: int, stream_budget: int,
                 buffer_count: int = 2,
                 max_tile_bytes: int = 16 * 1024 * 1024) -> int:
    """Largest lane-aligned D tile that divides d_pad and fits the VMEM budget."""
    per_col = tb * itemsize
    max_td = stream_budget // (2 * buffer_count * per_col)   # 2 streamed inputs
    max_td = min(max_td, max_tile_bytes // per_col)
    if d_pad >= 256:                  # keep >= 2 D-steps so DMA/compute overlap
        max_td = min(max_td, d_pad // 2)
    max_td = min(max(128, (max_td // 128) * 128), d_pad)
    best, t = 128, 128
    while t <= max_td:                # largest 128-multiple divisor of d_pad
        if d_pad % t == 0:
            best = t
        t += 128
    return best


# --------------------------------------------------------------------------
# Kernel: per-row reduction statistics over the feature axis.
# --------------------------------------------------------------------------
def _row_stats_kernel(x1_ref, x2_ref, n1_ref, n2_ref, dot_ref):
    """Accumulate per-row sum(x1*x1), sum(x2*x2), sum(x1*x2) over the D axis.

    grid = (row_blocks, d_blocks).  The (tB, 1) outputs are revisited across
    the D axis and serve directly as f32 accumulators.
    """
    k = pl.program_id(1)

    @pl.when(k == 0)
    def _init():
        n1_ref[...] = jnp.zeros_like(n1_ref)
        n2_ref[...] = jnp.zeros_like(n2_ref)
        dot_ref[...] = jnp.zeros_like(dot_ref)

    x1 = x1_ref[...].astype(jnp.float32)
    x2 = x2_ref[...].astype(jnp.float32)
    n1_ref[...] += jnp.sum(x1 * x1, axis=1, keepdims=True)
    n2_ref[...] += jnp.sum(x2 * x2, axis=1, keepdims=True)
    dot_ref[...] += jnp.sum(x1 * x2, axis=1, keepdims=True)


# --------------------------------------------------------------------------
# Wrapper.
# --------------------------------------------------------------------------
@functools.partial(
    jax.jit,
    static_argnames=("temp", "return_sim", "tile_b", "tile_d", "buffers"))
def spearman_correlation_loss(input1, input2, label, temp=0.5, return_sim=False,
                              tile_b=None, tile_d=None, buffers=None):
    B, D = input1.shape
    itemsize = jnp.dtype(input1.dtype).itemsize
    stream_budget, vmem_limit = _vmem_budgets()

    # ---- row (batch) tiling ------------------------------------------------
    if tile_b is not None:
        tb = int(tile_b)
    else:
        tb = _pick_tile_b(B)
        # Huge batch that is not a multiple of 8: pad it so it can be
        # row-tiled instead of blowing VMEM with a single (B, 128) block.
        if tb == B and B % 8 != 0 and 2 * 2 * B * 128 * itemsize > stream_budget:
            tb = _pick_tile_b(_round_up(B, 8))
    B_pad = B if B % tb == 0 else _round_up(B, tb)

    # ---- feature (D) tiling ------------------------------------------------
    D_pad = _round_up(max(D, 128), 128)
    if tile_d is not None:
        td = min(max(128, (int(tile_d) // 128) * 128), D_pad)
    else:
        td = _pick_tile_d(D_pad, tb, itemsize, stream_budget)
    if D_pad % td != 0:
        D_pad = _round_up(D_pad, td)

    n_b = B_pad // tb
    n_d = D_pad // td

    # ---- zero-pad (zero rows/cols do not change the row-wise sums) ----------
    x1, x2 = input1, input2
    if B_pad != B or D_pad != D:
        pad = ((0, B_pad - B), (0, D_pad - D))
        x1 = jnp.pad(x1, pad)
        x2 = jnp.pad(x2, pad)

    # ---- pipeline depth ------------------------------------------------------
    if buffers is not None:
        bufs = int(buffers)
    else:
        bufs = 3 if (tb * td * itemsize <= 2 * 1024 * 1024
                     and n_b * n_d >= 8) else 2

    x_spec = pl.BlockSpec((tb, td), lambda bi, k: (bi, k))
    if bufs > 2:
        try:
            x_spec = pl.BlockSpec((tb, td), lambda bi, k: (bi, k),
                                  pipeline_mode=pl.Buffered(bufs))
        except TypeError:
            pass  # older JAX without pipeline_mode: keep default double-buffering
    stat_spec = pl.BlockSpec((tb, 1), lambda bi, k: (bi, 0))

    n1sq, n2sq, dots = pl.pallas_call(
        _row_stats_kernel,
        out_shape=tuple(jax.ShapeDtypeStruct((B_pad, 1), jnp.float32)
                        for _ in range(3)),
        grid_spec=pltpu.PrefetchScalarGridSpec(
            num_scalar_prefetch=0,
            grid=(n_b, n_d),
            in_specs=[x_spec, x_spec],
            out_specs=[stat_spec, stat_spec, stat_spec],
        ),
        compiler_params=pltpu.CompilerParams(
            dimension_semantics=("parallel", "arbitrary"),
            vmem_limit_bytes=vmem_limit,
        ),
    )(x1, x2)

    # ---- O(B) epilogue in plain JAX (cheap; enables the "parallel" axis) ----
    n1sq = n1sq[:B, 0]
    n2sq = n2sq[:B, 0]
    dots = dots[:B, 0]
    eps = 1e-12  # matches F.normalize default eps (per-norm clamp)
    sim = dots / (jnp.maximum(jnp.sqrt(n1sq), eps) *
                  jnp.maximum(jnp.sqrt(n2sq), eps))

    lbl = label.astype(jnp.float32).reshape(B)
    sm = jax.nn.softmax(sim / temp, axis=0)
    sm_c = sm - jnp.mean(sm)
    lbl_c = lbl - jnp.mean(lbl)
    t_m1 = jnp.sqrt(jnp.sum(sm_c * sm_c))
    t_m2 = jnp.sqrt(jnp.sum(lbl_c * lbl_c))
    corr = jnp.sum(sm_c * lbl_c) / (t_m1 * t_m2 + 1e-05)
    loss = -corr
    if return_sim:
        return loss, sim
    return loss


# --------------------------------------------------------------------------
# Pure-JAX reference of the PyTorch forward (for correctness checks).
# --------------------------------------------------------------------------
def _reference(input1, input2, label, temp=0.5):
    x1 = input1.astype(jnp.float32)
    x2 = input2.astype(jnp.float32)

    def normalize(x):
        n = jnp.sqrt(jnp.sum(x * x, axis=1, keepdims=True))
        return x / jnp.maximum(n, 1e-12)

    sim = jnp.sum(normalize(x1) * normalize(x2), axis=1)      # (B,)
    sm = jax.nn.softmax(sim / temp, axis=0)
    sm = sm - jnp.mean(sm)
    lbl = label.astype(jnp.float32)
    lbl = lbl - jnp.mean(lbl)
    t1 = jnp.sqrt(jnp.sum(sm ** 2))
    t2 = jnp.sqrt(jnp.sum(lbl ** 2))
    corr = jnp.sum(sm * lbl) / (t1 * t2 + 1e-05)
    return -corr, sim


if __name__ == "__main__":
    root = jax.random.PRNGKey(0)
    keys = jax.random.split(root, 4)

    def run_case(seed_key, B, D, dtype, tol, **tile_kwargs):
        k1, k2, k3 = jax.random.split(seed_key, 3)
        x1 = jax.random.normal(k1, (B, D), dtype=jnp.float32).astype(dtype)
        x2 = jax.random.normal(k2, (B, D), dtype=jnp.float32).astype(dtype)
        lbl = jax.random.uniform(k3, (B,), dtype=jnp.float32)
        loss, sim = spearman_correlation_loss(x1, x2, lbl, temp=0.5,
                                              return_sim=True, **tile_kwargs)
        jax.block_until_ready((loss, sim))
        ref_loss, ref_sim = _reference(x1, x2, lbl, temp=0.5)
        np.testing.assert_allclose(np.asarray(loss), np.asarray(ref_loss),
                                   rtol=tol, atol=tol)
        np.testing.assert_allclose(np.asarray(sim), np.asarray(ref_sim),
                                   rtol=tol, atol=tol)

    # 1) auto tiling: single row block, 2 D-steps (exercises the D reduction).
    run_case(keys[0], 8, 1024, jnp.float32, 1e-5)
    # 2) forced small tiles: row-block "parallel" axis (nB=2), 8 D-steps,
    #    triple-buffered inputs (pl.Buffered path).
    run_case(keys[1], 16, 1024, jnp.float32, 1e-5, tile_b=8, tile_d=128)
    # 3) D not a multiple of 128 -> zero-padded to 256 (2 D-steps).
    run_case(keys[2], 8, 200, jnp.float32, 1e-5)
    # 4) bf16 streaming, cast to f32 inside the kernel.
    run_case(keys[3], 8, 512, jnp.bfloat16, 1e-4)

    # return_sim=False path.
    k1, k2, k3 = jax.random.split(keys[0], 3)
    loss_only = spearman_correlation_loss(
        jax.random.normal(k1, (8, 1024), dtype=jnp.float32),
        jax.random.normal(k2, (8, 1024), dtype=jnp.float32),
        jax.random.uniform(k3, (8,), dtype=jnp.float32),
        temp=0.5)
    jax.block_until_ready(loss_only)

    print("KERNEL_OK")
</pallas_src>

<mosaic_0001>
module attributes {stable_mosaic.version = 11 : i64} {
  func.func @_row_stats_kernel(%arg0: i32, %arg1: i32, %arg2: memref<8x512xf32, #tpu.memory_space<vmem>>, %arg3: memref<8x512xf32, #tpu.memory_space<vmem>>, %arg4: memref<8x1xf32, #tpu.memory_space<vmem>>, %arg5: memref<8x1xf32, #tpu.memory_space<vmem>>, %arg6: memref<8x1xf32, #tpu.memory_space<vmem>>) attributes {dimension_semantics = [#tpu.dimension_semantics<parallel>, #tpu.dimension_semantics<arbitrary>], iteration_bounds = array<i64: 1, 2>, scalar_prefetch = 0 : i64, scratch_operands = 0 : i64, tpu.core_type = #tpu.core_type<tc>, window_params = [{transform_indices = @transform_0, window_bounds = array<i64: 8, 512>}, {transform_indices = @transform_1, window_bounds = array<i64: 8, 512>}, {transform_indices = @transform_2, window_bounds = array<i64: 8, 1>}, {transform_indices = @transform_3, window_bounds = array<i64: 8, 1>}, {transform_indices = @transform_4, window_bounds = array<i64: 8, 1>}]} {
    %c0_i32 = arith.constant 0 : i32
    %0 = arith.cmpi eq, %arg1, %c0_i32 : i32
    %1 = arith.extui %0 : i1 to i32
    %c0_i32_0 = arith.constant 0 : i32
    %2 = arith.cmpi ne, %1, %c0_i32_0 : i32
    scf.if %2 {
      %cst_18 = arith.constant 0.000000e+00 : f32
      %23 = vector.broadcast %cst_18 : f32 to vector<8x1xf32>
      %c0_19 = arith.constant 0 : index
      %c0_20 = arith.constant 0 : index
      %24 = vector.load %arg4[%c0_19, %c0_20] : memref<8x1xf32, #tpu.memory_space<vmem>>, vector<8x1xf32>
      tpu.vector_store %arg4[%c0_19, %c0_20], %23 {strides = array<i32>} : memref<8x1xf32, #tpu.memory_space<vmem>>, vector<8x1xf32>,
      %cst_21 = arith.constant 0.000000e+00 : f32
      %25 = vector.broadcast %cst_21 : f32 to vector<8x1xf32>
      %c0_22 = arith.constant 0 : index
      %c0_23 = arith.constant 0 : index
      %26 = vector.load %arg5[%c0_22, %c0_23] : memref<8x1xf32, #tpu.memory_space<vmem>>, vector<8x1xf32>
      tpu.vector_store %arg5[%c0_22, %c0_23], %25 {strides = array<i32>} : memref<8x1xf32, #tpu.memory_space<vmem>>, vector<8x1xf32>,
      %cst_24 = arith.constant 0.000000e+00 : f32
      %27 = vector.broadcast %cst_24 : f32 to vector<8x1xf32>
      %c0_25 = arith.constant 0 : index
      %c0_26 = arith.constant 0 : index
      %28 = vector.load %arg6[%c0_25, %c0_26] : memref<8x1xf32, #tpu.memory_space<vmem>>, vector<8x1xf32>
      tpu.vector_store %arg6[%c0_25, %c0_26], %27 {strides = array<i32>} : memref<8x1xf32, #tpu.memory_space<vmem>>, vector<8x1xf32>,
    } else {
    }
    %c0 = arith.constant 0 : index
    %c0_1 = arith.constant 0 : index
    %3 = vector.load %arg2[%c0, %c0_1] : memref<8x512xf32, #tpu.memory_space<vmem>>, vector<8x512xf32>
    %c0_2 = arith.constant 0 : index
    %c0_3 = arith.constant 0 : index
    %4 = vector.load %arg3[%c0_2, %c0_3] : memref<8x512xf32, #tpu.memory_space<vmem>>, vector<8x512xf32>
    %c0_4 = arith.constant 0 : index
    %c0_5 = arith.constant 0 : index
    %5 = vector.load %arg4[%c0_4, %c0_5] : memref<8x1xf32, #tpu.memory_space<vmem>>, vector<8x1xf32>
    %6 = arith.mulf %3, %3 : vector<8x512xf32>
    %cst = arith.constant dense<0.000000e+00> : vector<8xf32>
    %7 = vector.multi_reduction <add>, %6, %cst [1] : vector<8x512xf32> to vector<8xf32>
    %8 = vector.shape_cast %7 : vector<8xf32> to vector<8x1xf32>
    %9 = arith.addf %5, %8 : vector<8x1xf32>
    %c0_6 = arith.constant 0 : index
    %c0_7 = arith.constant 0 : index
    %10 = vector.load %arg4[%c0_6, %c0_7] : memref<8x1xf32, #tpu.memory_space<vmem>>, vector<8x1xf32>
    tpu.vector_store %arg4[%c0_6, %c0_7], %9 {strides = array<i32>} : memref<8x1xf32, #tpu.memory_space<vmem>>, vector<8x1xf32>,
    %c0_8 = arith.constant 0 : index
    %c0_9 = arith.constant 0 : index
    %11 = vector.load %arg5[%c0_8, %c0_9] : memref<8x1xf32, #tpu.memory_space<vmem>>, vector<8x1xf32>
    %12 = arith.mulf %4, %4 : vector<8x512xf32>
    %cst_10 = arith.constant dense<0.000000e+00> : vector<8xf32>
    %13 = vector.multi_reduction <add>, %12, %cst_10 [1] : vector<8x512xf32> to vector<8xf32>
    %14 = vector.shape_cast %13 : vector<8xf32> to vector<8x1xf32>
    %15 = arith.addf %11, %14 : vector<8x1xf32>
    %c0_11 = arith.constant 0 : index
    %c0_12 = arith.constant 0 : index
    %16 = vector.load %arg5[%c0_11, %c0_12] : memref<8x1xf32, #tpu.memory_space<vmem>>, vector<8x1xf32>
    tpu.vector_store %arg5[%c0_11, %c0_12], %15 {strides = array<i32>} : memref<8x1xf32, #tpu.memory_space<vmem>>, vector<8x1xf32>,
    %c0_13 = arith.constant 0 : index
    %c0_14 = arith.constant 0 : index
    %17 = vector.load %arg6[%c0_13, %c0_14] : memref<8x1xf32, #tpu.memory_space<vmem>>, vector<8x1xf32>
    %18 = arith.mulf %3, %4 : vector<8x512xf32>
    %cst_15 = arith.constant dense<0.000000e+00> : vector<8xf32>
    %19 = vector.multi_reduction <add>, %18, %cst_15 [1] : vector<8x512xf32> to vector<8xf32>
    %20 = vector.shape_cast %19 : vector<8xf32> to vector<8x1xf32>
    %21 = arith.addf %17, %20 : vector<8x1xf32>
    %c0_16 = arith.constant 0 : index
    %c0_17 = arith.constant 0 : index
    %22 = vector.load %arg6[%c0_16, %c0_17] : memref<8x1xf32, #tpu.memory_space<vmem>>, vector<8x1xf32>
    tpu.vector_store %arg6[%c0_16, %c0_17], %21 {strides = array<i32>} : memref<8x1xf32, #tpu.memory_space<vmem>>, vector<8x1xf32>,
    return
  }
  func.func @transform_0(%arg0: i32, %arg1: i32) -> (i32, i32) {
    %c0_i32 = arith.constant 0 : i32
    return %arg0, %arg1 : i32, i32
  }
  func.func @transform_1(%arg0: i32, %arg1: i32) -> (i32, i32) {
    %c0_i32 = arith.constant 0 : i32
    return %arg0, %arg1 : i32, i32
  }
  func.func @transform_2(%arg0: i32, %arg1: i32) -> (i32, i32) {
    %c0_i32 = arith.constant 0 : i32
    %c0_i32_0 = arith.constant 0 : i32
    return %arg0, %c0_i32 : i32, i32
  }
  func.func @transform_3(%arg0: i32, %arg1: i32) -> (i32, i32) {
    %c0_i32 = arith.constant 0 : i32
    %c0_i32_0 = arith.constant 0 : i32
    return %arg0, %c0_i32 : i32, i32
  }
  func.func @transform_4(%arg0: i32, %arg1: i32) -> (i32, i32) {
    %c0_i32 = arith.constant 0 : i32
    %c0_i32_0 = arith.constant 0 : i32
    return %arg0, %c0_i32 : i32, i32
  }
}

</mosaic_0001>

<bundles_post_ra>
// kernel: spearman_correlation_loss.1
= control target key start
LH: loop header
LB: loop body
LE: loop exit
PB: predicated region body
PF: predicated region fallthrough
CT: control target
= control target key end

     0   :  { %10 = vsyncpa [#allocation3], 0  ;;  %s873_s0 = inlined_call_operand.hbm [shape: f32[8,1024], index: 0, kind: input, shape index: {}]   ;;  %s874_s1 = inlined_call_operand.hbm [shape: f32[8,1024], index: 1, kind: input, shape index: {}]   ;;  %s875_s2 = inlined_call_operand.vmem [shape: f32[8,1], index: 2, kind: output, shape index: {0}]   ;;  %s876_s3 = inlined_call_operand.vmem [shape: f32[8,1], index: 3, kind: output, shape index: {1}]   ;;  %s877_s4 = inlined_call_operand.vmem [shape: f32[8,1], index: 4, kind: output, shape index: {2}]  }
   0x1   :  { %12 = vsyncpa [#allocation3 + $0x1], 0 }
   0x2   :  { %13 = vsyncpa [#allocation5], 0 }
   0x3   :  { %15 = vsyncpa [#allocation5 + $0x1], 0  ;;  %s724_s15 = smov 0   ;;  %s726_s16 = smov 0  }
   0x4   :  { %s728_s17 = smov 0   ;;  %s730_s18 = smov 0  }
   0x5   :  { %s732_s19 = smov 0   ;;  %s734_s20 = smov 0  }
   0x6 LB: > { %s503_s21 = sadd.s32 4294967295, %s694_s20   ;;  %s30_s22 = sadd.s32 1, %s690_s19  ;;  %s694_s20 = sphi %s734_s20, %s21_s20   ;;  %s690_s19 = sphi %s732_s19, %s886_s19   ;;  %s686_s18 = sphi %s730_s18, %s885_s18   ;;  %s682_s17 = sphi %s728_s17, %s884_s17   ;;  %s678_s16 = sphi %s726_s16, %s883_s16   ;;  %s674_s15 = sphi %s724_s15, %s882_s15  }
   0x7   : > { %p31_p0 = scmp.ge.s32.totalorder %s30_s22, 2  ;;  %s42_s23 = sadd.s32 1, %s682_s17 }
   0x8   : > { %p49_p1 = scmp.ne.s32.totalorder %s682_s17, %s678_s16  ;;  %p50_p2 = scmp.eq.s32.totalorder %s694_s20, 0 }
   0x9   : > { %s888_s22 = smov (%p31_p0, %s30_s22), 0  ;;  %p55_p4 = scmp.ne.s32.totalorder %s678_s16, %s674_s15 }
   0xa   : > { %p760_p3 = por %p50_p2, %p49_p1  ;;  %s38_s25 = ssub.s32 %s690_s19, %s888_s22 }
   0xb   : > { %p56_p5 = scmp.eq.s32.totalorder %s503_s21, 0  ;;  %p40_p6 = scmp.eq.s32.totalorder %s38_s25, 0 }
   0xc   : > { %p534_p8 = scmp.lt.s32.totalorder %s694_s20, 2  ;;  %s776_s28 = sand.u32 1, %s682_s17  }
   0xd   : > { %p767_p7 = por %p56_p5, %p55_p4  ;;  %s521_s29 = sshll.u32 %s690_s19, 9 }
   0xe   : > { %s773_s27 = scalar_select %p40_p6, %s682_s17, %s42_s23  }
   0xf   : > { %s506_s30 = sshll.u32 %s776_s28, 5  ;;  %s197_s7 = scalar_lea.hbm %s873_s0, %s521_s29 }
  0x10   : > { %s189_s8 = scalar_lea.vmem [#allocation2], %s506_s30  ;;  %p785_p9 = pnand %p534_p8, %p760_p3 }
  0x11   : > { %s199_s9 = sshll.u32 %s189_s8, 4  ;;  %p512_p10 = scmp.ge.s32.totalorder %s694_s20, 1  ;;  %s200_s9 = int_to_ptr.vmem [resolvable:$true] %s199_s9 }
  0x12   : > { %p225_p11 = scmp.lt.s32.totalorder %s694_s20, 3  ;;  %s186_s11 = scalar_lea.sflag [#allocation3], %s776_s28 }
  0x13   : > { %p586_p12 = pneg %p785_p9  ;;  %s597_s12 = scalar_lea.vmem %s200_s9, 512 }
  0x14   : > { %p598_p13 = scmp.ne.s32.totalorder %s200_s9, %s597_s12  ;;  %s696_s13 = smov [#allocation2]  }
  0x15   : > { %s602_s14 = sshll.u32 %s696_s13, 4  ;;  %s603_s14 = int_to_ptr.vmem [resolvable:$false] %s602_s14 }
  0x16   : > { %p600_p0 = pnand %p598_p13, %p586_p12  ;;  %s604_s15 = scalar_lea.vmem %s603_s14, 1024 }
  0x17   : > { %p605_p2 = scmp.lt.s32.totalorder %s200_s9, %s603_s14  ;;  %p606_p3 = scmp.lt.s32.totalorder %s604_s15, %s597_s12 }
  0x18   : > { %p601_p1 = pneg %p600_p0 }
  0x19   : > { %p607_p4 = por %p606_p3, %p605_p2 }
  0x1b   : > { %p608_p5 = pnand %p607_p4, %p601_p1 }
  0x1d   : > { %611 = shalt.err (!%p608_p5)
}
  0x1e   : > { %530 = dma.hbm_to_vmem [thread:$0]  (!%p785_p9), %s197_s7, 512, %s200_s9, %s186_s11  }
  0x1f   : > { %p803_p6 = pnand %p512_p10, %p225_p11  ;;  %s218_s25 = scalar_lea.hbm %s874_s1, %s521_s29 }
  0x20   : > { %s210_s5 = scalar_lea.vmem [#allocation4], %s506_s30  ;;  %s207_s8 = scalar_lea.sflag [#allocation5], %s776_s28 }
  0x21   : > { %s220_s6 = sshll.u32 %s210_s5, 4  ;;  %s697_s7 = smov [#allocation4]   ;;  %s221_s6 = int_to_ptr.vmem [resolvable:$true] %s220_s6 }
  0x22   : > { %s625_s12 = scalar_lea.vmem %s221_s6, 512  ;;  %s630_s9 = sshll.u32 %s697_s7, 4  ;;  %s631_s9 = int_to_ptr.vmem [resolvable:$false] %s630_s9 }
  0x23   : > { %p626_p8 = scmp.ne.s32.totalorder %s221_s6, %s625_s12  ;;  %s632_s11 = scalar_lea.vmem %s631_s9, 1024 }
  0x24   : > { %p633_p10 = scmp.lt.s32.totalorder %s221_s6, %s631_s9  ;;  %p634_p11 = scmp.lt.s32.totalorder %s632_s11, %s625_s12 }
  0x25   : > { %p628_p13 = pnand %p626_p8, %p586_p12 }
  0x26   : > { %p635_p1 = por %p634_p11, %p633_p10 }
  0x27   : > { %p629_p0 = pneg %p628_p13 }
  0x29   : > { %p636_p2 = pnand %p635_p1, %p629_p0 }
  0x2b   : > { %639 = shalt.err (!%p636_p2)
}
  0x2c   : > { %533 = dma.hbm_to_vmem [thread:$0]  (!%p785_p9), %s218_s25, 512, %s221_s6, %s207_s8  }
  0x2d   : > { %229 = sbr.rel (%p803_p6) target bundleno = 217 (0xd9), region = 28  ;;  %s231_s28 = sand.u32 (!%p803_p6), 1, %s678_s16  }
  0x2e   : > { %s513_s29 = sshll.u32 (!%p803_p6), %s231_s28, 5  ;;  %s232_s30 = scalar_lea.sflag (!%p803_p6), [#allocation3], %s231_s28 }
  0x2f   : > { %s235_s13 = scalar_lea.vmem (!%p803_p6), [#allocation2], %s513_s29 }
  0x32   : > { %665 = dma.done.wait (%p767_p7), %s232_s30, 512  }
  0x33   : > { %667 = vsyncadd (%p767_p7), %s232_s30, 4294966784  ;;  %s241_s14 = scalar_lea.sflag [#allocation5], %s231_s28  ;;  %s244_s15 = scalar_lea.vmem [#allocation4], %s513_s29 }
  0x34   : > { %669 = dma.done.wait (%p767_p7), %s241_s14, 512  }
  0x35   : > { %671 = vsyncadd (%p767_p7), %s241_s14, 4294966784  ;;  %p515_p9 = scmp.ne.s32.totalorder %s686_s18, 0 }
  0x37   : > { %298 = sbr.rel (%p515_p9) target bundleno = 63 (0x3f), region = 40 }
  0x3c   : > { %vm299_vm0 = vcmask 7168   ;;  %v698_v0 = vmov 0.0  }
  0x3d   : > { %300 = vst.msk [vmem:[%s875_s2] sm:$0xff] %vm299_vm0, %v698_v0  ;;  %301 = vst.msk [vmem:[%s876_s3] sm:$0xff] %vm299_vm0, %v698_v0 }
  0x3e   : > { %302 = vst.msk [vmem:[%s877_s4] sm:$0xff] %vm299_vm0, %v698_v0 }
  0x3f PF: > { %v303_v1 = vld [vmem:[%s235_s13] sm:$0xff]  ;;  %v304_v2 = vld [vmem:[%s235_s13 + $0x8] sm:$0xff]  ;;  %v305_v3 = vld [vmem:[%s235_s13 + $0x10] sm:$0xff]  ;;  %vm322_vm1 = vcmask 7168  }
  0x40   : > { %v306_v4 = vld [vmem:[%s235_s13 + $0x18] sm:$0xff]  ;;  %v312_v5 = vmul.f32 %v303_v1, %v303_v1  ;;  %v313_v6 = vmul.f32 %v304_v2, %v304_v2  ;;  %v314_v7 = vmul.f32 %v305_v3, %v305_v3  ;;  %v307_v8 = vld [vmem:[%s244_s15] sm:$0xff]  ;;  %v308_v9 = vld [vmem:[%s244_s15 + $0x8] sm:$0xff] }
  0x41   : > { %v309_v10 = vld [vmem:[%s244_s15 + $0x10] sm:$0xff]  ;;  %v310_v11 = vld [vmem:[%s244_s15 + $0x18] sm:$0xff]  ;;  %v337_v12 = vmul.f32 %v307_v8, %v303_v1  ;;  %v338_v13 = vmul.f32 %v308_v9, %v304_v2  ;;  %v325_v14 = vmul.f32 %v307_v8, %v307_v8  ;;  %v315_v15 = vmul.f32 %v306_v4, %v306_v4 }
  0x42   : > { %v316_v16 = vadd.f32 %v313_v6, %v312_v5  ;;  %v339_v17 = vmul.f32 %v309_v10, %v305_v3  ;;  %v326_v18 = vmul.f32 %v308_v9, %v308_v9  ;;  %v340_v19 = vmul.f32 %v310_v11, %v306_v4 }
  0x43   : > { %v341_v20 = vadd.f32 %v338_v13, %v337_v12  ;;  %v327_v21 = vmul.f32 %v309_v10, %v309_v10  ;;  %v328_v23 = vmul.f32 %v310_v11, %v310_v11 }
  0x44   : > { %v317_v22 = vadd.f32 %v316_v16, %v314_v7  ;;  %v329_v24 = vadd.f32 %v326_v18, %v325_v14  ;;  %v311_v30 = vld [vmem:[%s875_s2] sm:$0xff] }
  0x45   : > { %v342_v25 = vadd.f32 %v341_v20, %v339_v17  ;;  %v336_v31 = vld [vmem:[%s877_s4] sm:$0xff] }
  0x46   : > { %v318_v26 = vadd.f32 %v317_v22, %v315_v15  ;;  %v330_v27 = vadd.f32 %v329_v24, %v327_v21  ;;  %v324_v36 = vld [vmem:[%s876_s3] sm:$0xff] }
  0x47   : > { %v343_v28 = vadd.f32 %v342_v25, %v340_v19 }
  0x48   : > { %319 = vadd.xlane.f32.xlu0 %v318_v26  ;;  %v331_v29 = vadd.f32 %v330_v27, %v328_v23 }
  0x49   : > { %344 = vadd.xlane.f32.xlu1 %v343_v28 }
  0x4c   : > { %332 = vadd.xlane.f32.xlu0 %v331_v29 }
  0xd1   : > { %v320_v32 = vpop.xlane.xlu0 %319 }
  0xd2   : > { %v321_v33 = vadd.f32 %v320_v32, %v311_v30  ;;  %v345_v34 = vpop.xlane.xlu1 %344 }
  0xd3   : > { %v346_v35 = vadd.f32 %v345_v34, %v336_v31 }
  0xd4   : > { %323 = vst.msk [vmem:[%s875_s2] sm:$0xff] %vm322_vm1, %v321_v33 }
  0xd5   : > { %347 = vst.msk [vmem:[%s877_s4] sm:$0xff] %vm322_vm1, %v346_v35  ;;  %v333_v37 = vpop.xlane.xlu0 %332 }
  0xd6   : > { %v334_v38 = vadd.f32 %v333_v37, %v324_v36 }
  0xd8   : > { %335 = vst.msk [vmem:[%s876_s3] sm:$0xff] %vm322_vm1, %v334_v38 }
  0xd9 PF: > { %s21_s20 = sadd.s32 1, %s694_s20   ;;  %s882_s15 = smov %s678_s16 }
  0xda   : > { %p18_p7 = scmp.ge.s32.totalorder %s21_s20, 4   ;;  %s883_s16 = smov %s682_s17 }
  0xdb   : > { %s884_s17 = smov %s773_s27  ;;  %s885_s18 = smov %s690_s19 }
  0xdc   : > { %s886_s19 = smov %s888_s22  ;;  %20 = sbr.rel (!%p18_p7) target bundleno = 6 (0x6), region = 109 }
  0xe1   :  { %395 = vsyncpa [#allocation3], 1 }
  0xe2   :  { %397 = vsyncpa [#allocation3 + $0x1], 1 }
  0xe3   :  { %398 = vsyncpa [#allocation5], 1 }
  0xe4   :  { %400 = vsyncpa [#allocation5 + $0x1], 1 }

</bundles_post_ra>
